<compile_context>
chip_gen: v5e
topology: v5e:2x2
jax: 0.10.0
libtpu: 0.0.40
codegen_flags: <defaults>
</compile_context>

<pallas_src>
import numpy as np
import jax
import jax.numpy as jnp
from jax.experimental import pallas as pl
from jax.experimental.pallas import tpu as pltpu


# ---------------------------------------------------------------------------
# Pallas kernel: per grid step i, gather BLOCK_ROWS rows (frame ids taken from
# the SMEM-prefetched id tables) from the two VMEM-resident banks and write
# them, concatenated along the lane axis, into one (BLOCK_ROWS, D_TOT) tile.
# ---------------------------------------------------------------------------
def _make_gather_concat_kernel(block_rows, d_rgb, d_aud):
    del d_aud  # only d_rgb (the concat split point) is needed explicitly

    def kernel(rgb_ids_ref, aud_ids_ref,      # scalar-prefetch (SMEM) frame ids
               rgb_bank_ref, aud_bank_ref,    # whole banks, VMEM-resident
               out_ref):                      # (block_rows, d_tot) VMEM tile
        base = pl.program_id(0) * block_rows
        # Static unroll over the rows of this tile: each row is an in-VMEM
        # dynamic-slice gather from both banks plus ONE full-lane-width store
        # (no per-row HBM DMAs, no masked sliced stores per bank).
        for r in range(block_rows):
            rid = rgb_ids_ref[base + r]
            aid = aud_ids_ref[base + r]
            rgb_row = rgb_bank_ref[pl.ds(rid, 1), :]   # (1, d_rgb)
            aud_row = aud_bank_ref[pl.ds(aid, 1), :]   # (1, d_aud)
            out_ref[r:r + 1, :] = jnp.concatenate([rgb_row, aud_row], axis=-1)

    return kernel


def rulstm_feats_pallas(rgb_bank, aud_bank, rgb_frames, aud_frames,
                        block_rows=8):
    """Gather + concat features for the given frame indices.

    rgb_bank:   (N_rgb, D_RGB) float32 feature bank (frame index on axis 0)
    aud_bank:   (N_aud, D_AUD) float32 feature bank
    rgb_frames: (T,) int32 frame ids for the rgb bank (already clamped)
    aud_frames: (T,) int32 frame ids for the audio bank (already clamped)
    returns:    (T, 1, 1, D_RGB + D_AUD) float32
    """
    T = int(rgb_frames.shape[0])
    n_rgb, d_rgb = rgb_bank.shape
    n_aud, d_aud = aud_bank.shape
    d_tot = d_rgb + d_aud

    B = block_rows
    T_pad = ((T + B - 1) // B) * B
    if T_pad != T:
        # Pad ids with the last (in-range) frame id; padded rows are sliced off.
        pad = T_pad - T
        rgb_frames = jnp.concatenate(
            [rgb_frames, jnp.full((pad,), rgb_frames[-1], jnp.int32)])
        aud_frames = jnp.concatenate(
            [aud_frames, jnp.full((pad,), aud_frames[-1], jnp.int32)])

    grid_spec = pltpu.PrefetchScalarGridSpec(
        num_scalar_prefetch=2,
        grid=(T_pad // B,),
        in_specs=[
            # Whole-bank blocks with constant index_map -> DMA'd to VMEM once
            # and kept resident across all grid steps.
            pl.BlockSpec((n_rgb, d_rgb), lambda i, rgb_ids, aud_ids: (0, 0)),
            pl.BlockSpec((n_aud, d_aud), lambda i, rgb_ids, aud_ids: (0, 0)),
        ],
        # Lane-dense AND sublane-dense output tile (8 sublanes x 3 full vregs).
        out_specs=pl.BlockSpec((B, d_tot), lambda i, rgb_ids, aud_ids: (i, 0)),
    )

    # Explicit VMEM budget: 2x banks (conservative: allow double-buffering) +
    # double-buffered output tiles + margin.  Clamped so the same setting is
    # safe on v5e (16 MiB scoped default) and v7x (64 MiB physical).
    bank_bytes = (rgb_bank.size + aud_bank.size) * rgb_bank.dtype.itemsize
    tile_bytes = B * d_tot * 4
    vmem_limit = int(min(max(2 * bank_bytes + 4 * tile_bytes + (2 << 20),
                             16 << 20), 56 << 20))

    flat = pl.pallas_call(
        _make_gather_concat_kernel(B, d_rgb, d_aud),
        out_shape=jax.ShapeDtypeStruct((T_pad, d_tot), jnp.float32),
        grid_spec=grid_spec,
        compiler_params=pltpu.CompilerParams(
            # Each grid step writes a disjoint output tile -> truly parallel
            # (lets v7x shard the frame axis across its two TensorCores).
            dimension_semantics=("parallel",),
            vmem_limit_bytes=vmem_limit),
    )(rgb_frames, aud_frames, rgb_bank, aud_bank)

    return flat[:T].reshape(T, 1, 1, d_tot)


# ---------------------------------------------------------------------------
# Glue: frame index computation (identical arithmetic to the PyTorch module).
# ---------------------------------------------------------------------------
def _compute_frames(start_sec, end_sec, fps):
    start_frame = np.floor(start_sec * fps)
    end_frame = np.floor(end_sec * fps)
    frames = np.arange(end_frame, start_frame, -1).astype(int)[::-1].copy()
    assert frames.max() >= 1, "The dataset shouldnt have cases otherwise."
    frames[frames < 1] = frames[frames >= 1].min()
    return frames


def _get_orig_video_fps(video_name):
    length = len(video_name.split('_')[-1])
    if length == 3:
        return 50.0
    elif length == 2:
        return 59.94005994005994
    else:
        raise ValueError(f'Unkown video name format: {video_name}')


def _convert_to_orig_video_fps(video_name, fps, frames):
    orig_fps = _get_orig_video_fps(video_name)
    return np.rint(frames / fps * orig_fps).astype(int)


def epic_rulstm_feats_forward(rgb_bank, aud_bank, video_name,
                              start_sec, end_sec, fps):
    """Mirrors EpicRULSTMFeatsReader._read_rulstm_features with two 'envs':
    one rgb-like bank (uses rulstm frame ids) and one audio-like bank (frame
    ids converted to the original video fps)."""
    frames = _compute_frames(start_sec, end_sec, fps)
    frames_audio = _convert_to_orig_video_fps(video_name, fps, frames)

    # Clamp to the banks' valid range host-side (stand-in for the LMDB
    # nearest-stored-frame / zero-fill fallback; also prevents OOB gathers).
    rgb_ids = jnp.asarray(np.clip(frames, 0, rgb_bank.shape[0] - 1),
                          dtype=jnp.int32)
    aud_ids = jnp.asarray(np.clip(frames_audio, 0, aud_bank.shape[0] - 1),
                          dtype=jnp.int32)

    final_feat = rulstm_feats_pallas(rgb_bank, aud_bank, rgb_ids, aud_ids)
    timings = {'T GetItem.GetVideo.I/O.reader.lmdb_read': 0.0}
    return final_feat, {}, {}, timings


if __name__ == "__main__":
    key = jax.random.PRNGKey(0)
    k_rgb, k_aud = jax.random.split(key)

    # Deterministic synthetic "LMDB" feature banks, indexed by frame number.
    N_RGB, N_AUD = 64, 96
    D_RGB, D_AUD = 256, 128
    D_TOT = D_RGB + D_AUD
    rgb_bank = jax.random.normal(k_rgb, (N_RGB, D_RGB), dtype=jnp.float32)
    aud_bank = jax.random.normal(k_aud, (N_AUD, D_AUD), dtype=jnp.float32)

    # Clip spec: fps=30 (module's get_frame_rate), 0.5 s clip -> T = 15 frames
    # (exercises padding to the 8-row tile) over 2 grid steps.
    video_name = "P01_101"   # last segment of length 3 -> orig fps 50.0
    start_sec, end_sec, fps = 1.0, 1.5, 30.0

    final_feat, _, _, timings = epic_rulstm_feats_forward(
        rgb_bank, aud_bank, video_name, start_sec, end_sec, fps)
    final_feat = jax.block_until_ready(final_feat)

    # Pure-JAX reference (gather + concat) to sanity-check the kernel.
    frames = _compute_frames(start_sec, end_sec, fps)
    frames_audio = _convert_to_orig_video_fps(video_name, fps, frames)
    rgb_ids = np.clip(frames, 0, N_RGB - 1)
    aud_ids = np.clip(frames_audio, 0, N_AUD - 1)
    ref_rgb = jnp.take(rgb_bank, jnp.asarray(rgb_ids), axis=0)
    ref_aud = jnp.take(aud_bank, jnp.asarray(aud_ids), axis=0)
    ref = jnp.concatenate([ref_rgb, ref_aud], axis=-1)[:, None, None, :]

    T = len(frames)
    assert final_feat.shape == (T, 1, 1, D_TOT), final_feat.shape
    assert final_feat.dtype == jnp.float32
    np.testing.assert_allclose(np.asarray(final_feat), np.asarray(ref),
                               rtol=0, atol=0)
    print("KERNEL_OK")
</pallas_src>

<mosaic_0001>
module attributes {stable_mosaic.version = 11 : i64} {
  func.func @kernel(%arg0: i32, %arg1: memref<16xi32, #tpu.memory_space<smem>>, %arg2: memref<16xi32, #tpu.memory_space<smem>>, %arg3: memref<64x256xf32, #tpu.memory_space<vmem>>, %arg4: memref<96x128xf32, #tpu.memory_space<vmem>>, %arg5: memref<8x384xf32, #tpu.memory_space<vmem>>) attributes {dimension_semantics = [#tpu.dimension_semantics<parallel>], iteration_bounds = array<i64: 2>, scalar_prefetch = 2 : i64, scratch_operands = 0 : i64, tpu.core_type = #tpu.core_type<tc>, window_params = [{pipeline_mode = #tpu.pipeline_mode<synchronous>, transform_indices = @transform_0, window_bounds = array<i64: 64, 256>}, {pipeline_mode = #tpu.pipeline_mode<synchronous>, transform_indices = @transform_1, window_bounds = array<i64: 96, 128>}, {transform_indices = @transform_2, window_bounds = array<i64: 8, 384>}]} {
    %c8_i32 = arith.constant 8 : i32
    %0 = arith.muli %arg0, %c8_i32 : i32
    %c0_i32 = arith.constant 0 : i32
    %1 = arith.addi %0, %c0_i32 : i32
    %2 = arith.index_cast %1 : i32 to index
    %3 = memref.load %arg1[%2] : memref<16xi32, #tpu.memory_space<smem>>
    %c0_i32_0 = arith.constant 0 : i32
    %4 = arith.addi %0, %c0_i32_0 : i32
    %5 = arith.index_cast %4 : i32 to index
    %6 = memref.load %arg2[%5] : memref<16xi32, #tpu.memory_space<smem>>
    %7 = arith.index_cast %3 : i32 to index
    %c0 = arith.constant 0 : index
    %8 = vector.load %arg3[%7, %c0] : memref<64x256xf32, #tpu.memory_space<vmem>>, vector<1x256xf32>
    %9 = arith.index_cast %6 : i32 to index
    %c0_1 = arith.constant 0 : index
    %10 = vector.load %arg4[%9, %c0_1] : memref<96x128xf32, #tpu.memory_space<vmem>>, vector<1x128xf32>
    %11 = tpu.concatenate %8, %10 in 1 : vector<1x256xf32>, vector<1x128xf32> -> vector<1x384xf32>
    %c0_2 = arith.constant 0 : index
    %c0_3 = arith.constant 0 : index
    %12 = vector.load %arg5[%c0_2, %c0_3] : memref<8x384xf32, #tpu.memory_space<vmem>>, vector<1x384xf32>
    tpu.vector_store %arg5[%c0_2, %c0_3], %11 {strides = array<i32>} : memref<8x384xf32, #tpu.memory_space<vmem>>, vector<1x384xf32>,
    %c1_i32 = arith.constant 1 : i32
    %13 = arith.addi %0, %c1_i32 : i32
    %14 = arith.index_cast %13 : i32 to index
    %15 = memref.load %arg1[%14] : memref<16xi32, #tpu.memory_space<smem>>
    %c1_i32_4 = arith.constant 1 : i32
    %16 = arith.addi %0, %c1_i32_4 : i32
    %17 = arith.index_cast %16 : i32 to index
    %18 = memref.load %arg2[%17] : memref<16xi32, #tpu.memory_space<smem>>
    %19 = arith.index_cast %15 : i32 to index
    %c0_5 = arith.constant 0 : index
    %20 = vector.load %arg3[%19, %c0_5] : memref<64x256xf32, #tpu.memory_space<vmem>>, vector<1x256xf32>
    %21 = arith.index_cast %18 : i32 to index
    %c0_6 = arith.constant 0 : index
    %22 = vector.load %arg4[%21, %c0_6] : memref<96x128xf32, #tpu.memory_space<vmem>>, vector<1x128xf32>
    %23 = tpu.concatenate %20, %22 in 1 : vector<1x256xf32>, vector<1x128xf32> -> vector<1x384xf32>
    %c1 = arith.constant 1 : index
    %c0_7 = arith.constant 0 : index
    %24 = vector.load %arg5[%c1, %c0_7] : memref<8x384xf32, #tpu.memory_space<vmem>>, vector<1x384xf32>
    tpu.vector_store %arg5[%c1, %c0_7], %23 {strides = array<i32>} : memref<8x384xf32, #tpu.memory_space<vmem>>, vector<1x384xf32>,
    %c2_i32 = arith.constant 2 : i32
    %25 = arith.addi %0, %c2_i32 : i32
    %26 = arith.index_cast %25 : i32 to index
    %27 = memref.load %arg1[%26] : memref<16xi32, #tpu.memory_space<smem>>
    %c2_i32_8 = arith.constant 2 : i32
    %28 = arith.addi %0, %c2_i32_8 : i32
    %29 = arith.index_cast %28 : i32 to index
    %30 = memref.load %arg2[%29] : memref<16xi32, #tpu.memory_space<smem>>
    %31 = arith.index_cast %27 : i32 to index
    %c0_9 = arith.constant 0 : index
    %32 = vector.load %arg3[%31, %c0_9] : memref<64x256xf32, #tpu.memory_space<vmem>>, vector<1x256xf32>
    %33 = arith.index_cast %30 : i32 to index
    %c0_10 = arith.constant 0 : index
    %34 = vector.load %arg4[%33, %c0_10] : memref<96x128xf32, #tpu.memory_space<vmem>>, vector<1x128xf32>
    %35 = tpu.concatenate %32, %34 in 1 : vector<1x256xf32>, vector<1x128xf32> -> vector<1x384xf32>
    %c2 = arith.constant 2 : index
    %c0_11 = arith.constant 0 : index
    %36 = vector.load %arg5[%c2, %c0_11] : memref<8x384xf32, #tpu.memory_space<vmem>>, vector<1x384xf32>
    tpu.vector_store %arg5[%c2, %c0_11], %35 {strides = array<i32>} : memref<8x384xf32, #tpu.memory_space<vmem>>, vector<1x384xf32>,
    %c3_i32 = arith.constant 3 : i32
    %37 = arith.addi %0, %c3_i32 : i32
    %38 = arith.index_cast %37 : i32 to index
    %39 = memref.load %arg1[%38] : memref<16xi32, #tpu.memory_space<smem>>
    %c3_i32_12 = arith.constant 3 : i32
    %40 = arith.addi %0, %c3_i32_12 : i32
    %41 = arith.index_cast %40 : i32 to index
    %42 = memref.load %arg2[%41] : memref<16xi32, #tpu.memory_space<smem>>
    %43 = arith.index_cast %39 : i32 to index
    %c0_13 = arith.constant 0 : index
    %44 = vector.load %arg3[%43, %c0_13] : memref<64x256xf32, #tpu.memory_space<vmem>>, vector<1x256xf32>
    %45 = arith.index_cast %42 : i32 to index
    %c0_14 = arith.constant 0 : index
    %46 = vector.load %arg4[%45, %c0_14] : memref<96x128xf32, #tpu.memory_space<vmem>>, vector<1x128xf32>
    %47 = tpu.concatenate %44, %46 in 1 : vector<1x256xf32>, vector<1x128xf32> -> vector<1x384xf32>
    %c3 = arith.constant 3 : index
    %c0_15 = arith.constant 0 : index
    %48 = vector.load %arg5[%c3, %c0_15] : memref<8x384xf32, #tpu.memory_space<vmem>>, vector<1x384xf32>
    tpu.vector_store %arg5[%c3, %c0_15], %47 {strides = array<i32>} : memref<8x384xf32, #tpu.memory_space<vmem>>, vector<1x384xf32>,
    %c4_i32 = arith.constant 4 : i32
    %49 = arith.addi %0, %c4_i32 : i32
    %50 = arith.index_cast %49 : i32 to index
    %51 = memref.load %arg1[%50] : memref<16xi32, #tpu.memory_space<smem>>
    %c4_i32_16 = arith.constant 4 : i32
    %52 = arith.addi %0, %c4_i32_16 : i32
    %53 = arith.index_cast %52 : i32 to index
    %54 = memref.load %arg2[%53] : memref<16xi32, #tpu.memory_space<smem>>
    %55 = arith.index_cast %51 : i32 to index
    %c0_17 = arith.constant 0 : index
    %56 = vector.load %arg3[%55, %c0_17] : memref<64x256xf32, #tpu.memory_space<vmem>>, vector<1x256xf32>
    %57 = arith.index_cast %54 : i32 to index
    %c0_18 = arith.constant 0 : index
    %58 = vector.load %arg4[%57, %c0_18] : memref<96x128xf32, #tpu.memory_space<vmem>>, vector<1x128xf32>
    %59 = tpu.concatenate %56, %58 in 1 : vector<1x256xf32>, vector<1x128xf32> -> vector<1x384xf32>
    %c4 = arith.constant 4 : index
    %c0_19 = arith.constant 0 : index
    %60 = vector.load %arg5[%c4, %c0_19] : memref<8x384xf32, #tpu.memory_space<vmem>>, vector<1x384xf32>
    tpu.vector_store %arg5[%c4, %c0_19], %59 {strides = array<i32>} : memref<8x384xf32, #tpu.memory_space<vmem>>, vector<1x384xf32>,
    %c5_i32 = arith.constant 5 : i32
    %61 = arith.addi %0, %c5_i32 : i32
    %62 = arith.index_cast %61 : i32 to index
    %63 = memref.load %arg1[%62] : memref<16xi32, #tpu.memory_space<smem>>
    %c5_i32_20 = arith.constant 5 : i32
    %64 = arith.addi %0, %c5_i32_20 : i32
    %65 = arith.index_cast %64 : i32 to index
    %66 = memref.load %arg2[%65] : memref<16xi32, #tpu.memory_space<smem>>
    %67 = arith.index_cast %63 : i32 to index
    %c0_21 = arith.constant 0 : index
    %68 = vector.load %arg3[%67, %c0_21] : memref<64x256xf32, #tpu.memory_space<vmem>>, vector<1x256xf32>
    %69 = arith.index_cast %66 : i32 to index
    %c0_22 = arith.constant 0 : index
    %70 = vector.load %arg4[%69, %c0_22] : memref<96x128xf32, #tpu.memory_space<vmem>>, vector<1x128xf32>
    %71 = tpu.concatenate %68, %70 in 1 : vector<1x256xf32>, vector<1x128xf32> -> vector<1x384xf32>
    %c5 = arith.constant 5 : index
    %c0_23 = arith.constant 0 : index
    %72 = vector.load %arg5[%c5, %c0_23] : memref<8x384xf32, #tpu.memory_space<vmem>>, vector<1x384xf32>
    tpu.vector_store %arg5[%c5, %c0_23], %71 {strides = array<i32>} : memref<8x384xf32, #tpu.memory_space<vmem>>, vector<1x384xf32>,
    %c6_i32 = arith.constant 6 : i32
    %73 = arith.addi %0, %c6_i32 : i32
    %74 = arith.index_cast %73 : i32 to index
    %75 = memref.load %arg1[%74] : memref<16xi32, #tpu.memory_space<smem>>
    %c6_i32_24 = arith.constant 6 : i32
    %76 = arith.addi %0, %c6_i32_24 : i32
    %77 = arith.index_cast %76 : i32 to index
    %78 = memref.load %arg2[%77] : memref<16xi32, #tpu.memory_space<smem>>
    %79 = arith.index_cast %75 : i32 to index
    %c0_25 = arith.constant 0 : index
    %80 = vector.load %arg3[%79, %c0_25] : memref<64x256xf32, #tpu.memory_space<vmem>>, vector<1x256xf32>
    %81 = arith.index_cast %78 : i32 to index
    %c0_26 = arith.constant 0 : index
    %82 = vector.load %arg4[%81, %c0_26] : memref<96x128xf32, #tpu.memory_space<vmem>>, vector<1x128xf32>
    %83 = tpu.concatenate %80, %82 in 1 : vector<1x256xf32>, vector<1x128xf32> -> vector<1x384xf32>
    %c6 = arith.constant 6 : index
    %c0_27 = arith.constant 0 : index
    %84 = vector.load %arg5[%c6, %c0_27] : memref<8x384xf32, #tpu.memory_space<vmem>>, vector<1x384xf32>
    tpu.vector_store %arg5[%c6, %c0_27], %83 {strides = array<i32>} : memref<8x384xf32, #tpu.memory_space<vmem>>, vector<1x384xf32>,
    %c7_i32 = arith.constant 7 : i32
    %85 = arith.addi %0, %c7_i32 : i32
    %86 = arith.index_cast %85 : i32 to index
    %87 = memref.load %arg1[%86] : memref<16xi32, #tpu.memory_space<smem>>
    %c7_i32_28 = arith.constant 7 : i32
    %88 = arith.addi %0, %c7_i32_28 : i32
    %89 = arith.index_cast %88 : i32 to index
    %90 = memref.load %arg2[%89] : memref<16xi32, #tpu.memory_space<smem>>
    %91 = arith.index_cast %87 : i32 to index
    %c0_29 = arith.constant 0 : index
    %92 = vector.load %arg3[%91, %c0_29] : memref<64x256xf32, #tpu.memory_space<vmem>>, vector<1x256xf32>
    %93 = arith.index_cast %90 : i32 to index
    %c0_30 = arith.constant 0 : index
    %94 = vector.load %arg4[%93, %c0_30] : memref<96x128xf32, #tpu.memory_space<vmem>>, vector<1x128xf32>
    %95 = tpu.concatenate %92, %94 in 1 : vector<1x256xf32>, vector<1x128xf32> -> vector<1x384xf32>
    %c7 = arith.constant 7 : index
    %c0_31 = arith.constant 0 : index
    %96 = vector.load %arg5[%c7, %c0_31] : memref<8x384xf32, #tpu.memory_space<vmem>>, vector<1x384xf32>
    tpu.vector_store %arg5[%c7, %c0_31], %95 {strides = array<i32>} : memref<8x384xf32, #tpu.memory_space<vmem>>, vector<1x384xf32>,
    return
  }
  func.func @transform_0(%arg0: i32, %arg1: memref<16xi32, #tpu.memory_space<smem>>, %arg2: memref<16xi32, #tpu.memory_space<smem>>) -> (i32, i32) {
    %c0_i32 = arith.constant 0 : i32
    %c0_i32_0 = arith.constant 0 : i32
    %c0_i32_1 = arith.constant 0 : i32
    return %c0_i32, %c0_i32_0 : i32, i32
  }
  func.func @transform_1(%arg0: i32, %arg1: memref<16xi32, #tpu.memory_space<smem>>, %arg2: memref<16xi32, #tpu.memory_space<smem>>) -> (i32, i32) {
    %c0_i32 = arith.constant 0 : i32
    %c0_i32_0 = arith.constant 0 : i32
    %c0_i32_1 = arith.constant 0 : i32
    return %c0_i32, %c0_i32_0 : i32, i32
  }
  func.func @transform_2(%arg0: i32, %arg1: memref<16xi32, #tpu.memory_space<smem>>, %arg2: memref<16xi32, #tpu.memory_space<smem>>) -> (i32, i32) {
    %c0_i32 = arith.constant 0 : i32
    %c0_i32_0 = arith.constant 0 : i32
    return %arg0, %c0_i32 : i32, i32
  }
}

</mosaic_0001>

<bundles_post_ra>
// kernel: tpu_custom_call.1
= control target key start
LH: loop header
LB: loop body
LE: loop exit
PB: predicated region body
PF: predicated region fallthrough
CT: control target
= control target key end

     0   :  { %s770_s21 = smov [#allocation3]   ;;  %s771_s22 = smov [#allocation4]   ;;  %s1002_s0 = inlined_call_operand.hbm [shape: s32[16], index: 0, kind: input, shape index: {}]   ;;  %s1003_s2 = inlined_call_operand.hbm [shape: f32[64,256], index: 2, kind: input, shape index: {}]   ;;  %s1004_s3 = inlined_call_operand.hbm [shape: f32[96,128], index: 3, kind: input, shape index: {}]   ;;  %s1005_s4 = inlined_call_operand.hbm [shape: f32[16,384], index: 4, kind: output, shape index: {}]   ;;  %s1006_s1 = inlined_call_operand.hbm [shape: s32[16], index: 1, kind: input, shape index: {}]  }
   0x1   :  { %s10_s17 = sshll.u32 %s1002_s0, 4  ;;  %s15_s20 = sshll.u32 %s1006_s1, 4  ;;  %s11_s17 = int_to_ptr.hbm [resolvable:$true] %s10_s17  ;;  %s16_s20 = int_to_ptr.hbm [resolvable:$true] %s15_s20 }
   0x2   :  { %13 = dma.hbm_to_smem %s11_s17, 16, %s770_s21, [#allocation2] }
   0x3   :  { %18 = dma.hbm_to_smem %s16_s20, 16, %s771_s22, [#allocation2] }
   0x4   :  { %740 = dma.done.wait [#allocation2], 32 }
   0x5   :  { %741 = vsyncadd [#allocation2], 4294967264 }
   0x6   :  { %21 = sfence }
   0x7   :  { %22 = vsyncpa [#allocation6], 0 }
   0x8   :  { %23 = vsyncpa [#allocation9], 0 }
   0x9   :  { %24 = vsyncpa [#allocation7], 0 }
   0xa   :  { %26 = vsyncpa [#allocation7 + $0x1], 0  ;;  %s809_s23 = smov 0   ;;  %s811_s0 = smov 0  }
   0xb   :  { %s813_s24 = smov 0   ;;  %s815_s1 = smov 0  }
   0xc LB: > { %s830_s25 = sadd.s32 4294967295, %s768_s1   ;;  %s502_s26 = sadd.s32 4294967294, %s768_s1   ;;  %s768_s1 = sphi %s815_s1, %s1019_s1   ;;  %s764_s24 = sphi %s813_s24, %s1018_s24   ;;  %s760_s0 = sphi %s811_s0, %s1017_s0   ;;  %s756_s23 = sphi %s809_s23, %s1016_s23  }
   0xd   : > { %s834_s27 = sadd.s32 1, %s768_s1   ;;  %s81_s28 = sadd.s32 1, %s764_s24 }
   0xe   : > { %s78_s29 = ssub.s32 %s768_s1, %s834_s27  ;;  %p91_p0 = scmp.ne.s32.totalorder %s764_s24, %s760_s0 }
   0xf   : > { %p79_p1 = scmp.eq.s32.totalorder %s78_s29, 0  ;;  %p92_p2 = scmp.eq.s32.totalorder %s830_s25, 1 }
  0x10   : > { %p97_p3 = scmp.ne.s32.totalorder %s760_s0, %s756_s23  ;;  %p98_p4 = scmp.eq.s32.totalorder %s502_s26, 1 }
  0x11   : > { %s845_s30 = scalar_select %p79_p1, %s764_s24, %s81_s28  }
  0x12   : > { %p847_p5 = por %p92_p2, %p91_p0  ;;  %p851_p6 = por %p98_p4, %p97_p3 }
  0x13   : > { %p503_p7 = scmp.ge.s32.totalorder %s768_s1, 1  ;;  %p105_p8 = scmp.lt.s32.totalorder %s768_s1, 3 }
  0x14   : > { %p567_p9 = scmp.eq.s32.totalorder %s830_s25, 0  ;;  %s116_s10 = sshll.u32 %s1003_s2, 4  ;;  %s117_s10 = int_to_ptr.hbm [resolvable:$true] %s116_s10 }
  0x15   : > { %p858_p10 = pnand %p503_p7, %p105_p8  ;;  %s772_s11 = smov [#allocation5]  }
  0x16   : > { %s118_s12 = sshll.u32 %s772_s11, 4  ;;  %s130_s15 = sshll.u32 %s1004_s3, 4  ;;  %s119_s12 = int_to_ptr.vmem [resolvable:$true] %s118_s12  ;;  %s131_s15 = int_to_ptr.hbm [resolvable:$true] %s130_s15 }
  0x17   : > { %p556_p11 = pneg %p858_p10  ;;  %s773_s16 = smov 256  }
  0x18   : > { %s774_s17 = smov 16   ;;  %s775_s18 = smov [#allocation8]  }
  0x19   : > { %p557_p12 = pnand %p567_p9, %p556_p11  ;;  %s132_s19 = sshll.u32 %s775_s18, 4  ;;  %s133_s19 = int_to_ptr.vmem [resolvable:$true] %s132_s19 }
  0x1a   : > { %s776_s20 = smov 128   ;;  %s777_s21 = smov 8  }
  0x1b   : > { %559 = dma.hbm_to_vmem [thread:$0]  (!%p557_p12), %s117_s10, 2048, %s119_s12, [#allocation6], %s773_s16, %s773_s16, %s774_s17  }
  0x1c   : > { %562 = dma.hbm_to_vmem [thread:$0]  (!%p557_p12), %s131_s15, 1536, %s133_s19, [#allocation9], %s776_s20, %s776_s20, %s777_s21  }
  0x1d   : > { %148 = sbr.rel (%p858_p10) target bundleno = 94 (0x5e), region = 28 }
  0x22   : > { %743 = dma.done.wait (%p567_p9), [#allocation6], 2048  }
  0x23   : > { %745 = vsyncadd (%p567_p9), [#allocation6], 4294965248 }
  0x24   : > { %747 = dma.done.wait (%p567_p9), [#allocation9], 1536  }
  0x25   : > { %749 = vsyncadd (%p567_p9), [#allocation9], 4294965760  ;;  %s1007_s22 = sand.u32 1, %s760_s0   ;;  %s884_s26 = sshll.u32 %s830_s25, 3  ;;  %v196_v2 = vlaneseq  ;;  %vm191_vm0 = vcmask 1040384   ;;  %vm193_vm1 = vcmask 1041408  }
  0x26   : > { %s888_s28 = smul.u32 24, %s1007_s22  ;;  %s172_s29 = sld [smem:[#allocation3 + %s884_s26]] }
  0x27   : > { %s173_s7 = sld [smem:[#allocation4 + %s884_s26]]  ;;  %s202_s8 = sadd.s32 1, %s884_s26  ;;  %vm902_vm2 = vcmp.lt.s32.totalorder %v196_v2, 384 }
  0x28   : > { %s203_s9 = sld [smem:[#allocation3 + %s202_s8]]  ;;  %s228_s10 = sadd.s32 2, %s884_s26 }
  0x29   : > { %s204_s11 = sld [smem:[#allocation4 + %s202_s8]] }
  0x2a   : > { %s894_s12 = sld [smem:[#allocation3 + %s228_s10]] }
  0x2b   : > { %s897_s18 = sld [smem:[#allocation4 + %s228_s10]] }
  0x2c   : > { %s174_s14 = sshra.s32 %s172_s29, 3  ;;  %s177_s15 = sand.u32 7, %s172_s29 }
  0x2d   : > { %s536_s16 = sshll.u32 %s174_s14, 4  ;;  %s183_s19 = scalar_lea.vmem [#allocation8], %s173_s7 }
  0x2e   : > { %s180_s17 = sadd.s32 %s536_s16, %s177_s15  ;;  %v184_v0 = vld [vmem:[%s183_s19] sm:$0x1]  ;;  %s205_s20 = sshra.s32 %s203_s9, 3 }
  0x2f   : > { %s181_s21 = scalar_lea.vmem [#allocation5], %s180_s17  ;;  %s208_s22 = sand.u32 7, %s203_s9  ;;  %v190_v5 = vrot.slane %v184_v0, 6 }
  0x30   : > { %v182_v1 = vld [vmem:[%s181_s21] ss:$8 sm:$0x3]  ;;  %s537_s8 = sshll.u32 %s205_s20, 4  ;;  %s214_s29 = scalar_lea.vmem [#allocation8], %s204_s11 }
  0x31   : > { %v186_v3 = vperm.slane %v182_v1, 0  ;;  %v187_v4 = vperm.slane %v182_v1, 1  ;;  %s211_s13 = sadd.s32 %s537_s8, %s208_s22  ;;  %v215_v6 = vld [vmem:[%s214_s29] sm:$0x1]  ;;  %s231_s7 = sshra.s32 %s894_s12, 3 }
  0x32   : > { %s212_s10 = scalar_lea.vmem [#allocation5], %s211_s13  ;;  %s234_s14 = sand.u32 7, %s894_s12  ;;  %v221_v13 = vrot.slane %v215_v6, 6 }
  0x33   : > { %v189_v7 = vrot.slane %v187_v4, 7  ;;  %v213_v8 = vld [vmem:[%s212_s10] ss:$8 sm:$0x3]  ;;  %s280_s15 = sadd.s32 4, %s884_s26  ;;  %s538_s22 = sshll.u32 %s231_s7, 4 }
  0x34   : > { %v217_v10 = vperm.slane %v213_v8, 0  ;;  %v218_v11 = vperm.slane %v213_v8, 1  ;;  %s237_s9 = sadd.s32 %s538_s22, %s234_s14  ;;  %s1013_s11 = sadd.s32 3, %s884_s26 }
  0x35   : > { %v192_v12 = vsel %vm191_vm0, %v186_v3, %v189_v7  ;;  %s255_s16 = sld [smem:[#allocation3 + %s1013_s11]]  ;;  %s240_s13 = scalar_lea.vmem [#allocation8], %s897_s18 }
  0x36   : > { %v194_v14 = vsel %vm193_vm1, %v192_v12, %v190_v5  ;;  %v220_v15 = vrot.slane %v218_v11, 7  ;;  %v241_v16 = vld [vmem:[%s240_s13] sm:$0x1]  ;;  %s1014_s12 = smov %s1013_s11  ;;  %s914_s19 = scalar_lea.vmem [#allocation10], %s888_s28 }
  0x37   : > { %s256_s17 = sld [smem:[#allocation4 + %s1014_s12]]  ;;  %200 = vst.msk [vmem:[%s914_s19] ss:$8 sm:$0x7] %vm902_vm2, %v194_v14  ;;  %s238_s20 = scalar_lea.vmem [#allocation5], %s237_s9  ;;  %v247_v22 = vrot.slane %v241_v16, 6 }
  0x38   : > { %v239_v17 = vld [vmem:[%s238_s20] ss:$8 sm:$0x3]  ;;  %v222_v18 = vsel %vm191_vm0, %v217_v10, %v220_v15  ;;  %s281_s21 = sld [smem:[#allocation3 + %s280_s15]]  ;;  %s306_s8 = sadd.s32 5, %s884_s26 }
  0x39   : > { %v243_v19 = vperm.slane %v239_v17, 0  ;;  %v244_v20 = vperm.slane %v239_v17, 1  ;;  %v223_v21 = vsel %vm193_vm1, %v222_v18, %v221_v13  ;;  %s282_s18 = sld [smem:[#allocation4 + %s280_s15]]  ;;  %s332_s29 = sadd.s32 6, %s884_s26 }
  0x3a   : > { %514 = vst.msk [vmem:[%s914_s19 + $0x1] ss:$8 sm:$0x7] %vm902_vm2, %v223_v21  ;;  %s925_s28 = sld [smem:[#allocation3 + %s306_s8]] }
  0x3b   : > { %v246_v23 = vrot.slane %v244_v20, 7  ;;  %s257_s7 = sshra.s32 %s255_s16, 3  ;;  %s260_s10 = sand.u32 7, %s255_s16 }
  0x3c   : > { %s539_s14 = sshll.u32 %s257_s7, 4  ;;  %s930_s11 = sld [smem:[#allocation4 + %s306_s8]] }
  0x3d   : > { %v248_v24 = vsel %vm191_vm0, %v243_v19, %v246_v23  ;;  %s263_s22 = sadd.s32 %s539_s14, %s260_s10  ;;  %s266_s9 = scalar_lea.vmem [#allocation8], %s256_s17 }
  0x3e   : > { %v249_v25 = vsel %vm193_vm1, %v248_v24, %v247_v22  ;;  %v267_v26 = vld [vmem:[%s266_s9] sm:$0x1]  ;;  %s283_s15 = sshra.s32 %s281_s21, 3  ;;  %s264_s13 = scalar_lea.vmem [#allocation5], %s263_s22 }
  0x3f   : > { %517 = vst.msk [vmem:[%s914_s19 + $0x2] ss:$8 sm:$0x7] %vm902_vm2, %v249_v25  ;;  %v265_v27 = vld [vmem:[%s264_s13] ss:$8 sm:$0x3] }
  0x40   : > { %s286_s16 = sand.u32 7, %s281_s21  ;;  %s540_s12 = sshll.u32 %s283_s15, 4  ;;  %v269_v28 = vperm.slane %v265_v27, 0  ;;  %v270_v29 = vperm.slane %v265_v27, 1  ;;  %v273_v30 = vrot.slane %v267_v26, 6 }
  0x41   : > { %s289_s20 = sadd.s32 %s540_s12, %s286_s16  ;;  %s292_s7 = scalar_lea.vmem [#allocation8], %s282_s18 }
  0x42   : > { %v293_v31 = vld [vmem:[%s292_s7] sm:$0x1]  ;;  %s309_s17 = sshra.s32 %s925_s28, 3  ;;  %v272_v32 = vrot.slane %v270_v29, 7  ;;  %s290_s8 = scalar_lea.vmem [#allocation5], %s289_s20 }
  0x43   : > { %v291_v33 = vld [vmem:[%s290_s8] ss:$8 sm:$0x3]  ;;  %s312_s10 = sand.u32 7, %s925_s28  ;;  %s358_s14 = sadd.s32 7, %s884_s26  ;;  %v299_v37 = vrot.slane %v293_v31, 6 }
  0x44   : > { %v295_v34 = vperm.slane %v291_v33, 0  ;;  %v296_v35 = vperm.slane %v291_v33, 1  ;;  %s541_s21 = sshll.u32 %s309_s17, 4  ;;  %v274_v36 = vsel %vm191_vm0, %v269_v28, %v272_v32  ;;  %s333_s9 = sld [smem:[#allocation3 + %s332_s29]] }
  0x45   : > { %s315_s22 = sadd.s32 %s541_s21, %s312_s10  ;;  %v275_v38 = vsel %vm193_vm1, %v274_v36, %v273_v30  ;;  %s318_s18 = scalar_lea.vmem [#allocation8], %s930_s11 }
  0x46   : > { %v298_v39 = vrot.slane %v296_v35, 7  ;;  %v319_v40 = vld [vmem:[%s318_s18] sm:$0x1]  ;;  %s334_s15 = sld [smem:[#allocation4 + %s332_s29]]  ;;  %s316_s28 = scalar_lea.vmem [#allocation5], %s315_s22 }
  0x47   : > { %520 = vst.msk [vmem:[%s914_s19 + $0x3] ss:$8 sm:$0x7] %vm902_vm2, %v275_v38  ;;  %v317_v41 = vld [vmem:[%s316_s28] ss:$8 sm:$0x3] }
  0x48   : > { %v300_v42 = vsel %vm191_vm0, %v295_v34, %v298_v39  ;;  %v321_v43 = vperm.slane %v317_v41, 0  ;;  %v322_v44 = vperm.slane %v317_v41, 1  ;;  %s359_s13 = sld [smem:[#allocation3 + %s358_s14]]  ;;  %v325_v46 = vrot.slane %v319_v40, 6  ;;  %s545_s7 = smul.u32 24, %s830_s25 }
  0x49   : > { %v301_v45 = vsel %vm193_vm1, %v300_v42, %v299_v37  ;;  %s360_s16 = sld [smem:[#allocation4 + %s358_s14]]  ;;  %s398_s28 = sshll.u32 %s914_s19, 4  ;;  %s399_s28 = int_to_ptr.vmem [resolvable:$true] %s398_s28 }
  0x4a   : > { %523 = vst.msk [vmem:[%s914_s19 + $0x4] ss:$8 sm:$0x7] %vm902_vm2, %v301_v45  ;;  %v324_v47 = vrot.slane %v322_v44, 7  ;;  %s335_s26 = sshra.s32 %s333_s9, 3  ;;  %s338_s29 = sand.u32 7, %s333_s9 }
  0x4b   : > { %s542_s11 = sshll.u32 %s335_s26, 4  ;;  %s396_s25 = scalar_lea.hbm %s1005_s4, %s545_s7 }
  0x4c   : > { %v326_v48 = vsel %vm191_vm0, %v321_v43, %v324_v47  ;;  %s341_s12 = sadd.s32 %s542_s11, %s338_s29  ;;  %s344_s20 = scalar_lea.vmem [#allocation8], %s334_s15 }
  0x4d   : > { %v327_v49 = vsel %vm193_vm1, %v326_v48, %v325_v46  ;;  %v345_v50 = vld [vmem:[%s344_s20] sm:$0x1]  ;;  %s342_s8 = scalar_lea.vmem [#allocation5], %s341_s12  ;;  %s716_s7 = scalar_lea.hbm %s1005_s4, 48 }
  0x4e   : > { %526 = vst.msk [vmem:[%s914_s19 + $0x5] ss:$8 sm:$0x7] %vm902_vm2, %v327_v49  ;;  %s361_s17 = sshra.s32 %s359_s13, 3  ;;  %s364_s10 = sand.u32 7, %s359_s13  ;;  %v351_v54 = vrot.slane %v345_v50, 6 }
  0x4f   : > { %v343_v51 = vld [vmem:[%s342_s8] ss:$8 sm:$0x3]  ;;  %s543_s14 = sshll.u32 %s361_s17, 4  ;;  %s370_s22 = scalar_lea.vmem [#allocation8], %s360_s16 }
  0x50   : > { %v347_v52 = vperm.slane %v343_v51, 0  ;;  %v348_v53 = vperm.slane %v343_v51, 1  ;;  %s367_s21 = sadd.s32 %s543_s14, %s364_s10  ;;  %v371_v55 = vld [vmem:[%s370_s22] sm:$0x1]  ;;  %s400_s13 = sshll.u32 %s396_s25, 4  ;;  %s401_s13 = int_to_ptr.hbm [resolvable:$true] %s400_s13 }
  0x51   : > { %s368_s15 = scalar_lea.vmem [#allocation5], %s367_s21  ;;  %v377_v61 = vrot.slane %v371_v55, 6  ;;  %s1015_s16 = sand.u32 1, %s760_s0  }
  0x52   : > { %v350_v56 = vrot.slane %v348_v53, 7  ;;  %v369_v57 = vld [vmem:[%s368_s15] ss:$8 sm:$0x3]  ;;  %s385_s26 = scalar_lea.sflag [#allocation7], %s1015_s16  ;;  %s710_s29 = sshra.s32 %s401_s13, 4  ;;  %s711_s29 = int_to_ptr.hbm [resolvable:$true] %s710_s29 }
  0x53   : > { %v373_v58 = vperm.slane %v369_v57, 0  ;;  %v374_v59 = vperm.slane %v369_v57, 1  ;;  %s712_s11 = scalar_lea.hbm %s711_s29, 24  ;;  %p717_p2 = scmp.lt.s32.totalorder %s711_s29, %s1005_s4 }
  0x54   : > { %v352_v60 = vsel %vm191_vm0, %v347_v52, %v350_v56  ;;  %p713_p13 = scmp.ne.s32.totalorder %s711_s29, %s712_s11  ;;  %p718_p3 = scmp.lt.s32.totalorder %s716_s7, %s712_s11 }
  0x55   : > { %v353_v62 = vsel %vm193_vm1, %v352_v60, %v351_v54  ;;  %v376_v63 = vrot.slane %v374_v59, 7 }
  0x56   : > { %529 = vst.msk [vmem:[%s914_s19 + $0x6] ss:$8 sm:$0x7] %vm902_vm2, %v353_v62  ;;  %p714_p0 = pnand %p713_p13, %p847_p5  ;;  %p719_p4 = por %p718_p3, %p717_p2 }
  0x57   : > { %v378_v0 = vsel %vm191_vm0, %v373_v58, %v376_v63 }
  0x58   : > { %v379_v1 = vsel %vm193_vm1, %v378_v0, %v377_v61  ;;  %p715_p1 = pneg %p714_p0 }
  0x59   : > { %532 = vst.msk [vmem:[%s914_s19 + $0x7] ss:$8 sm:$0x7] %vm902_vm2, %v379_v1 }
  0x5a   : > { %p720_p7 = pnand %p719_p4, %p715_p1 }
  0x5c   : > { %723 = shalt.err (!%p720_p7)
}
  0x5d   : > { %554 = dma.vmem_to_hbm [thread:$0]  (%p847_p5), %s399_s28, 384, %s401_s13, %s385_s26  }
  0x5e PF: > { %p571_p8 = scmp.ge.s32.totalorder %s768_s1, 2  ;;  %s412_s19 = sand.u32 1, %s756_s23  }
  0x5f   : > { %s413_s10 = scalar_lea.sflag [#allocation7], %s412_s19 }
  0x60   : > { %p564_p9 = pnand %p571_p8, %p851_p6 }
  0x62   : > { %p565_p10 = pneg %p564_p9 }
  0x64   : > { %751 = dma.done.wait (%p565_p10), %s413_s10, 384  }
  0x65   : > { %753 = vsyncadd (%p565_p10), %s413_s10, 4294966912  ;;  %p29_p11 = scmp.ge.s32.totalorder %s834_s27, 4   ;;  %s1016_s23 = smov %s760_s0 }
  0x66   : > { %s1017_s0 = smov %s764_s24  ;;  %s1018_s24 = smov %s845_s30 }
  0x67   : > { %s1019_s1 = smov %s834_s27  ;;  %31 = sbr.rel (!%p29_p11) target bundleno = 12 (0xc), region = 92 }
  0x6c   :  { %419 = vsyncpa [#allocation6], 1 }
  0x6d   :  { %421 = vsyncpa [#allocation6 + $0x1], 1 }
  0x6e   :  { %422 = vsyncpa [#allocation9], 1 }
  0x6f   :  { %423 = vsyncpa [#allocation7], 1 }
  0x70   :  { %425 = vsyncpa [#allocation7 + $0x1], 1 }

</bundles_post_ra>
